<compile_context>
chip_gen: v7x
topology: tpu7x:2x2x1
jax: 0.10.0
libtpu: 0.0.40
codegen_flags: <defaults>
</compile_context>

<pallas_src>
import functools

import jax
import jax.numpy as jnp
from jax.experimental import pallas as pl
from jax.experimental.pallas import tpu as pltpu


_VPU_LAST_MAX_OUT = 8  # use VPU+XLU head instead of the MXU for tiny out_dims


def _round_up(n, m):
    return (n + m - 1) // m * m


def _mlp_kernel(n_layers, out_dims, last_vpu, x_ref, t_ref, *refs):
    """refs = (w0, b0, w1, b1, ..., w_{L-1}, b_{L-1}, out_ref).

    Activations are feature-major: h has shape (features, tile_n).
    """
    out_ref = refs[-1]
    params = refs[:-1]

    xv = x_ref[...]                               # (1, tile_n) f32
    tv = t_ref[...]                               # (1, tile_n) f32

    # ---- Layer 0: K=2 -> two broadcast FMAs on the VPU (MXU would use <2%). ----
    w0 = params[0][...]                           # (out0, 2) f32
    b0 = params[1][...]                           # (out0, 1) f32
    h = jnp.maximum(w0[:, 0:1] * xv + w0[:, 1:2] * tv + b0, 0.0)   # (out0, tile_n)

    # ---- Hidden layers: w @ h on the MXU, f32 accumulate. ----
    for layer in range(1, n_layers - 1):
        w = params[2 * layer][...]                # (H, H), f32 or bf16
        b = params[2 * layer + 1][...]            # (H, 1) f32
        h = jnp.dot(w, h.astype(w.dtype), preferred_element_type=jnp.float32) + b
        h = jnp.maximum(h, 0.0)

    # ---- Last layer (ReLU afterwards, matching the PyTorch module). ----
    if n_layers > 1:
        w = params[2 * (n_layers - 1)][...]
        b = params[2 * (n_layers - 1) + 1][...]
        if last_vpu:
            # Tiny head: VPU multiply + sublane reduce (XLU); w is pre-transposed
            # to (H, out_dims) so its columns broadcast against h's sublanes.
            cols = [jnp.sum(w[:, o:o + 1] * h, axis=0, keepdims=True)
                    for o in range(out_dims)]
            y = cols[0] if out_dims == 1 else jnp.concatenate(cols, axis=0)
            y = y + b
        else:
            y = jnp.dot(w, h.astype(w.dtype), preferred_element_type=jnp.float32) + b
        h = jnp.maximum(y, 0.0)

    out_ref[...] = h.astype(out_ref.dtype)        # (out_dims, tile_n) lane-dense store


def mlp_forward(x_row, t_row, weights, biases, *, tile_n=512,
                compute_dtype=jnp.float32):
    """x_row, t_row: (1, N) f32, N % tile_n == 0.
    weights[i]: torch-native (out_i, in_i). biases[i]: (out_i,).
    Returns (out_dims, N) f32.
    compute_dtype=jnp.bfloat16 halves MXU-operand / weight-DMA bytes (v6e/v7x).
    """
    n_layers = len(weights)
    out_dims = weights[-1].shape[0]
    N = x_row.shape[1]
    assert x_row.shape == (1, N) and t_row.shape == (1, N)
    assert N % tile_n == 0 and tile_n % 128 == 0

    last_vpu = (n_layers > 1) and (out_dims <= _VPU_LAST_MAX_OUT)

    # Kernel-layout params. Weights stay (out, in) for `w @ h`, except the last
    # layer on the VPU-reduce path which is pre-transposed to (in, out).
    # Biases become (out, 1) columns so they broadcast along lanes.
    kweights, kbiases = [], []
    for idx, (w, b) in enumerate(zip(weights, biases)):
        is_last = idx == n_layers - 1
        if is_last and last_vpu:
            kw = w.T.astype(jnp.float32)          # VPU path stays f32
        elif idx == 0:
            kw = w.astype(jnp.float32)            # VPU FMA path stays f32
        else:
            kw = w.astype(compute_dtype)          # MXU operand dtype
        kweights.append(kw)
        kbiases.append(b.reshape(-1, 1).astype(jnp.float32))

    kernel = functools.partial(_mlp_kernel, n_layers, out_dims, last_vpu)

    # Batch tiles stream over the grid on the lane axis; the tiny weights /
    # biases use full-array blocks and stay resident in VMEM across all steps.
    in_specs = [pl.BlockSpec((1, tile_n), lambda i: (0, i)),
                pl.BlockSpec((1, tile_n), lambda i: (0, i))]
    operands = [x_row, t_row]
    for w, b in zip(kweights, kbiases):
        in_specs.append(pl.BlockSpec(w.shape, lambda i: (0, 0)))
        in_specs.append(pl.BlockSpec(b.shape, lambda i: (0, 0)))
        operands.append(w)
        operands.append(b)

    flops = 2 * N * sum(int(w.shape[0]) * int(w.shape[1]) for w in weights)
    param_bytes = (sum(w.size * w.dtype.itemsize for w in kweights)
                   + sum(b.size * 4 for b in kbiases))
    bytes_accessed = 2 * N * 4 + out_dims * N * 4 + param_bytes

    return pl.pallas_call(
        kernel,
        out_shape=jax.ShapeDtypeStruct((out_dims, N), jnp.float32),
        grid_spec=pltpu.PrefetchScalarGridSpec(
            num_scalar_prefetch=0,
            grid=(N // tile_n,),
            in_specs=in_specs,
            out_specs=pl.BlockSpec((out_dims, tile_n), lambda i: (0, i)),
        ),
        compiler_params=pltpu.CompilerParams(
            dimension_semantics=("parallel",)),   # lets v7x shard tiles on 2 TCs
        cost_estimate=pl.CostEstimate(flops=flops, transcendentals=0,
                                      bytes_accessed=bytes_accessed),
    )(*operands)


def network_forward(x, t, weights, biases, *, max_tile_n=512,
                    compute_dtype=jnp.float32):
    """Reproduces Network.forward: stack (x, t) on a new last axis, run the MLP.
    (x, t are kept separate all the way to the kernel; the "stack" happens
    implicitly in the layer-0 FMA — no stacked-input HBM round trip.)"""
    assert x.shape == t.shape
    lead_shape = x.shape
    out_dims = weights[-1].shape[0]

    xf = x.reshape(1, -1).astype(jnp.float32)
    tf = t.reshape(1, -1).astype(jnp.float32)
    N = xf.shape[1]

    # Lane-axis tile: multiple of 128, up to max_tile_n.
    tile_n = min(max_tile_n, _round_up(N, 128))
    n_pad = _round_up(N, tile_n)
    if n_pad != N:
        xf = jnp.pad(xf, ((0, 0), (0, n_pad - N)))
        tf = jnp.pad(tf, ((0, 0), (0, n_pad - N)))

    out = mlp_forward(xf, tf, weights, biases, tile_n=tile_n,
                      compute_dtype=compute_dtype)        # (out_dims, n_pad)
    out = out[:, :N]
    return jnp.transpose(out).reshape(*lead_shape, out_dims)


def init_params(n_layers, hidden_dims, output_dims, key):
    """nn.Linear-shaped params: weights (out, in), biases (out,)."""
    input_dims = 2
    weights, biases = [], []
    for idx in range(n_layers):
        in_c = input_dims if idx == 0 else hidden_dims
        out_c = output_dims if idx == n_layers - 1 else hidden_dims
        key, kw, kb = jax.random.split(key, 3)
        bound = 1.0 / jnp.sqrt(in_c)
        w = jax.random.uniform(kw, (out_c, in_c), jnp.float32, -bound, bound)
        b = jax.random.uniform(kb, (out_c,), jnp.float32, -bound, bound)
        weights.append(w)
        biases.append(b)
    return weights, biases


def _reference(x, t, weights, biases):
    """Pure-JAX reference of Network.forward.

    The first (K=2) and 1-wide last layers are written elementwise — the same
    mathematics as the Linear layers — so both sides stay in the same f32
    precision regime as the kernel (which computes them on the VPU)."""
    inputs = jnp.stack((x, t), axis=x.ndim).astype(jnp.float32)
    lead = inputs.shape[:-1]
    h = inputs.reshape(-1, 2)
    n_layers = len(weights)
    for idx, (w, b) in enumerate(zip(weights, biases)):
        if idx == 0:
            z = h[:, 0:1] * w[:, 0][None, :] + h[:, 1:2] * w[:, 1][None, :] + b[None, :]
        elif idx == n_layers - 1 and w.shape[0] == 1:
            z = jnp.sum(h * w[0][None, :], axis=-1, keepdims=True) + b[None, :]
        else:
            z = h @ w.T + b[None, :]
        h = jnp.maximum(z, 0.0)
    return h.reshape(*lead, -1)


if __name__ == "__main__":
    # TODO(synk): x.requires_grad / t.requires_grad is autograd plumbing in the
    # PyTorch module; a forward-only Pallas kernel has no equivalent.
    n_layers, hidden_dims, output_dims = 3, 32, 1
    key = jax.random.PRNGKey(0)
    weights, biases = init_params(n_layers, hidden_dims, output_dims, key)

    kx, kt = jax.random.split(jax.random.PRNGKey(0))
    # small PINN-like collocation grid: (batch=2, points=16)
    x = jax.random.uniform(kx, (2, 16), jnp.float32)
    t = jax.random.uniform(kt, (2, 16), jnp.float32)

    out = jax.block_until_ready(network_forward(x, t, weights, biases))
    ref = _reference(x, t, weights, biases)
    assert out.shape == (2, 16, output_dims), out.shape
    assert jnp.allclose(out, ref, atol=1e-4, rtol=1e-4)

    # Second check: shape that forces padding and a multi-step (parallel) grid.
    kx2, kt2 = jax.random.split(jax.random.PRNGKey(2))
    x2 = jax.random.uniform(kx2, (4, 300), jnp.float32)
    t2 = jax.random.uniform(kt2, (4, 300), jnp.float32)
    out2 = jax.block_until_ready(network_forward(x2, t2, weights, biases))
    ref2 = _reference(x2, t2, weights, biases)
    assert out2.shape == (4, 300, output_dims), out2.shape
    assert jnp.allclose(out2, ref2, atol=1e-4, rtol=1e-4)

    print("KERNEL_OK")
</pallas_src>

<mosaic_0001>
module attributes {stable_mosaic.version = 11 : i64} {
  func.func @_mlp_kernel(%arg0: i32, %arg1: memref<1x128xf32, #tpu.memory_space<vmem>>, %arg2: memref<1x128xf32, #tpu.memory_space<vmem>>, %arg3: memref<32x2xf32, #tpu.memory_space<vmem>>, %arg4: memref<32x1xf32, #tpu.memory_space<vmem>>, %arg5: memref<32x32xf32, #tpu.memory_space<vmem>>, %arg6: memref<32x1xf32, #tpu.memory_space<vmem>>, %arg7: memref<32x1xf32, #tpu.memory_space<vmem>>, %arg8: memref<1x1xf32, #tpu.memory_space<vmem>>, %arg9: memref<1x128xf32, #tpu.memory_space<vmem>>) attributes {dimension_semantics = [#tpu.dimension_semantics<parallel>], iteration_bounds = array<i64: 1>, scalar_prefetch = 0 : i64, scratch_operands = 0 : i64, tpu.core_type = #tpu.core_type<tc>, window_params = [{transform_indices = @transform_0, window_bounds = array<i64: 1, 128>}, {transform_indices = @transform_1, window_bounds = array<i64: 1, 128>}, {pipeline_mode = #tpu.pipeline_mode<synchronous>, transform_indices = @transform_2, window_bounds = array<i64: 32, 2>}, {pipeline_mode = #tpu.pipeline_mode<synchronous>, transform_indices = @transform_3, window_bounds = array<i64: 32, 1>}, {pipeline_mode = #tpu.pipeline_mode<synchronous>, transform_indices = @transform_4, window_bounds = array<i64: 32, 32>}, {pipeline_mode = #tpu.pipeline_mode<synchronous>, transform_indices = @transform_5, window_bounds = array<i64: 32, 1>}, {pipeline_mode = #tpu.pipeline_mode<synchronous>, transform_indices = @transform_6, window_bounds = array<i64: 32, 1>}, {pipeline_mode = #tpu.pipeline_mode<synchronous>, transform_indices = @transform_7, window_bounds = array<i64: 1, 1>}, {transform_indices = @transform_8, window_bounds = array<i64: 1, 128>}]} {
    %c0 = arith.constant 0 : index
    %c0_0 = arith.constant 0 : index
    %0 = vector.load %arg1[%c0, %c0_0] : memref<1x128xf32, #tpu.memory_space<vmem>>, vector<1x128xf32>
    %c0_1 = arith.constant 0 : index
    %c0_2 = arith.constant 0 : index
    %1 = vector.load %arg2[%c0_1, %c0_2] : memref<1x128xf32, #tpu.memory_space<vmem>>, vector<1x128xf32>
    %c0_3 = arith.constant 0 : index
    %c0_4 = arith.constant 0 : index
    %2 = vector.load %arg3[%c0_3, %c0_4] : memref<32x2xf32, #tpu.memory_space<vmem>>, vector<32x2xf32>
    %c0_5 = arith.constant 0 : index
    %c0_6 = arith.constant 0 : index
    %3 = vector.load %arg4[%c0_5, %c0_6] : memref<32x1xf32, #tpu.memory_space<vmem>>, vector<32x1xf32>
    %4 = vector.extract_strided_slice %2 {offsets = [0, 0], sizes = [32, 1], strides = [1, 1]} : vector<32x2xf32> to vector<32x1xf32>
    %5 = vector.broadcast %4 : vector<32x1xf32> to vector<32x128xf32>
    %6 = vector.broadcast %0 : vector<1x128xf32> to vector<32x128xf32>
    %7 = arith.mulf %5, %6 : vector<32x128xf32>
    %8 = vector.extract_strided_slice %2 {offsets = [0, 1], sizes = [32, 1], strides = [1, 1]} : vector<32x2xf32> to vector<32x1xf32>
    %9 = vector.broadcast %8 : vector<32x1xf32> to vector<32x128xf32>
    %10 = vector.broadcast %1 : vector<1x128xf32> to vector<32x128xf32>
    %11 = arith.mulf %9, %10 : vector<32x128xf32>
    %12 = arith.addf %7, %11 : vector<32x128xf32>
    %13 = vector.broadcast %3 : vector<32x1xf32> to vector<32x128xf32>
    %14 = arith.addf %12, %13 : vector<32x128xf32>
    %cst = arith.constant 0.000000e+00 : f32
    %15 = vector.broadcast %cst : f32 to vector<32x128xf32>
    %16 = arith.maximumf %14, %15 : vector<32x128xf32>
    %c0_7 = arith.constant 0 : index
    %c0_8 = arith.constant 0 : index
    %17 = vector.load %arg5[%c0_7, %c0_8] : memref<32x32xf32, #tpu.memory_space<vmem>>, vector<32x32xf32>
    %c0_9 = arith.constant 0 : index
    %c0_10 = arith.constant 0 : index
    %18 = vector.load %arg6[%c0_9, %c0_10] : memref<32x1xf32, #tpu.memory_space<vmem>>, vector<32x1xf32>
    %cst_11 = arith.constant dense<0.000000e+00> : vector<32x128xf32>
    %19 = tpu.matmul %17, %16, %cst_11 {dimension_numbers = #tpu.dot_dimension_numbers<[1], [0], [0], [1], [0, 0, 1, 1], [], []>} : vector<32x32xf32>, vector<32x128xf32>, vector<32x128xf32> -> vector<32x128xf32>
    %20 = vector.broadcast %18 : vector<32x1xf32> to vector<32x128xf32>
    %21 = arith.addf %19, %20 : vector<32x128xf32>
    %cst_12 = arith.constant 0.000000e+00 : f32
    %22 = vector.broadcast %cst_12 : f32 to vector<32x128xf32>
    %23 = arith.maximumf %21, %22 : vector<32x128xf32>
    %c0_13 = arith.constant 0 : index
    %c0_14 = arith.constant 0 : index
    %24 = vector.load %arg7[%c0_13, %c0_14] : memref<32x1xf32, #tpu.memory_space<vmem>>, vector<32x1xf32>
    %c0_15 = arith.constant 0 : index
    %c0_16 = arith.constant 0 : index
    %25 = vector.load %arg8[%c0_15, %c0_16] : memref<1x1xf32, #tpu.memory_space<vmem>>, vector<1x1xf32>
    %26 = vector.broadcast %24 : vector<32x1xf32> to vector<32x128xf32>
    %27 = arith.mulf %26, %23 : vector<32x128xf32>
    %cst_17 = arith.constant dense<0.000000e+00> : vector<128xf32>
    %28 = vector.multi_reduction <add>, %27, %cst_17 [0] : vector<32x128xf32> to vector<128xf32>
    %29 = vector.shape_cast %28 : vector<128xf32> to vector<1x128xf32>
    %30 = vector.broadcast %25 : vector<1x1xf32> to vector<1x128xf32>
    %31 = arith.addf %29, %30 : vector<1x128xf32>
    %cst_18 = arith.constant 0.000000e+00 : f32
    %32 = vector.broadcast %cst_18 : f32 to vector<1x128xf32>
    %33 = arith.maximumf %31, %32 : vector<1x128xf32>
    %c0_19 = arith.constant 0 : index
    %c0_20 = arith.constant 0 : index
    %34 = vector.load %arg9[%c0_19, %c0_20] : memref<1x128xf32, #tpu.memory_space<vmem>>, vector<1x128xf32>
    tpu.vector_store %arg9[%c0_19, %c0_20], %33 {strides = array<i32>} : memref<1x128xf32, #tpu.memory_space<vmem>>, vector<1x128xf32>,
    return
  }
  func.func @transform_0(%arg0: i32) -> (i32, i32) {
    %c0_i32 = arith.constant 0 : i32
    %c0_i32_0 = arith.constant 0 : i32
    return %c0_i32, %arg0 : i32, i32
  }
  func.func @transform_1(%arg0: i32) -> (i32, i32) {
    %c0_i32 = arith.constant 0 : i32
    %c0_i32_0 = arith.constant 0 : i32
    return %c0_i32, %arg0 : i32, i32
  }
  func.func @transform_2(%arg0: i32) -> (i32, i32) {
    %c0_i32 = arith.constant 0 : i32
    %c0_i32_0 = arith.constant 0 : i32
    %c0_i32_1 = arith.constant 0 : i32
    return %c0_i32, %c0_i32_0 : i32, i32
  }
  func.func @transform_3(%arg0: i32) -> (i32, i32) {
    %c0_i32 = arith.constant 0 : i32
    %c0_i32_0 = arith.constant 0 : i32
    %c0_i32_1 = arith.constant 0 : i32
    return %c0_i32, %c0_i32_0 : i32, i32
  }
  func.func @transform_4(%arg0: i32) -> (i32, i32) {
    %c0_i32 = arith.constant 0 : i32
    %c0_i32_0 = arith.constant 0 : i32
    %c0_i32_1 = arith.constant 0 : i32
    return %c0_i32, %c0_i32_0 : i32, i32
  }
  func.func @transform_5(%arg0: i32) -> (i32, i32) {
    %c0_i32 = arith.constant 0 : i32
    %c0_i32_0 = arith.constant 0 : i32
    %c0_i32_1 = arith.constant 0 : i32
    return %c0_i32, %c0_i32_0 : i32, i32
  }
  func.func @transform_6(%arg0: i32) -> (i32, i32) {
    %c0_i32 = arith.constant 0 : i32
    %c0_i32_0 = arith.constant 0 : i32
    %c0_i32_1 = arith.constant 0 : i32
    return %c0_i32, %c0_i32_0 : i32, i32
  }
  func.func @transform_7(%arg0: i32) -> (i32, i32) {
    %c0_i32 = arith.constant 0 : i32
    %c0_i32_0 = arith.constant 0 : i32
    %c0_i32_1 = arith.constant 0 : i32
    return %c0_i32, %c0_i32_0 : i32, i32
  }
  func.func @transform_8(%arg0: i32) -> (i32, i32) {
    %c0_i32 = arith.constant 0 : i32
    %c0_i32_0 = arith.constant 0 : i32
    return %c0_i32, %arg0 : i32, i32
  }
}

</mosaic_0001>

<bundles_post_ra>
// kernel: tpu_custom_call.1
= control target key start
LH: loop header
LB: loop body
LE: loop exit
PB: predicated region body
PF: predicated region fallthrough
CT: control target
= control target key end

     0   :  { %s530_s0 = inlined_call_operand.vmem [shape: f32[1,128], index: 0, kind: input, shape index: {}]   ;;  %s531_s1 = inlined_call_operand.vmem [shape: f32[1,128], index: 1, kind: input, shape index: {}]   ;;  %s532_s2 = inlined_call_operand.vmem [shape: f32[32,2], index: 2, kind: input, shape index: {}]   ;;  %s533_s3 = inlined_call_operand.vmem [shape: f32[32,1], index: 3, kind: input, shape index: {}]   ;;  %s534_s4 = inlined_call_operand.vmem [shape: f32[32,32], index: 4, kind: input, shape index: {}]   ;;  %s535_s5 = inlined_call_operand.vmem [shape: f32[32,1], index: 5, kind: input, shape index: {}]   ;;  %s536_s6 = inlined_call_operand.vmem [shape: f32[32,1], index: 6, kind: input, shape index: {}]   ;;  %s537_s7 = inlined_call_operand.<no memory space> [shape: f32[1,1], index: 7, kind: input, shape index: {}]   ;;  %s538_s8 = inlined_call_operand.hbm [shape: f32[1,128], index: 8, kind: output, shape index: {}]  }
   0x1   :  { %v13_v0 = vstv %s537_s7 }
   0x2   :  { %14 = vst [vmem:[#allocation2] sm:$0x1] %v13_v0 }
   0x3   :  { %v36_v1 = vld [vmem:[%s532_s2 + $0x10] sm:$0xff]  ;;  %v34_v2 = vld [vmem:[%s532_s2] sm:$0xff]  ;;  %v397_v3 = vmov 1   ;;  %v35_v4 = vld [vmem:[%s532_s2 + $0x8] sm:$0xff]  ;;  %v398_v5 = vmov 0  }
   0x4   :  { %369 = vset.pattern.permute.xlu0 %v397_v3  ;;  %367 = vset.pattern.permute.xlu1 %v397_v3 }
   0x5   :  { %81 = vperm.xlu0 %369, %v36_v1   ;;  %73 = vperm.xlu1 %367, %v34_v2  }
   0x9   :  { %370 = vset.pattern.permute.xlu0 %v398_v5  ;;  %77 = vperm.xlu1 %367, %v35_v4  }
   0xa   :  { %15 = vsyncpa [#allocation4], 0  ;;  %44 = vperm.xlu0 %370, %v34_v2   ;;  %v37_v6 = vld [vmem:[%s532_s2 + $0x18] sm:$0xff]  ;;  %v39_v7 = vld [vmem:[%s533_s3 + $0x8] sm:$0xff]  ;;  %vm158_vm0 = vcmask 261120  }
   0xb   :  { %v38_v8 = vld [vmem:[%s533_s3] sm:$0xff]  ;;  %v40_v10 = vld [vmem:[%s533_s3 + $0x10] sm:$0xff]  ;;  %v41_v12 = vld [vmem:[%s533_s3 + $0x18] sm:$0xff] }
   0xc   :  { %v134_v9 = vld [vmem:[%s535_s5] sm:$0xff]  ;;  %v136_v11 = vld [vmem:[%s535_s5 + $0x10] sm:$0xff]  ;;  %v135_v14 = vld [vmem:[%s535_s5 + $0x8] sm:$0xff] }
   0xd   :  { %368 = vset.pattern.permute.xlu1 %v398_v5  ;;  %v260_v13 = vld [vmem:[%s536_s6] sm:$0xff]  ;;  %v262_v15 = vld [vmem:[%s536_s6 + $0x10] sm:$0xff]  ;;  %v137_v16 = vld [vmem:[%s535_s5 + $0x18] sm:$0xff] }
   0xe   :  { %49 = vperm.xlu0 %370, %v35_v4   ;;  %59 = vperm.xlu1 %368, %v37_v6   ;;  %v264_v17 = vld [vmem:[#allocation2] sm:$0x1]  ;;  %v132_v19 = vld [vmem:[%s534_s4 + $0x10] sm:$0xff]  ;;  %v261_v20 = vld [vmem:[%s536_s6 + $0x8] sm:$0xff] }
   0xf   :  { %v130_v18 = vld [vmem:[%s534_s4] sm:$0xff]  ;;  %349 = vmatprep.mubr.msk.f32.mxu1 %vm158_vm0, %v132_v19  ;;  %v263_v21 = vld [vmem:[%s536_s6 + $0x18] sm:$0xff]  ;;  %v131_v58 = vld [vmem:[%s534_s4 + $0x8] sm:$0xff] }
  0x10   :  { %346 = vmatprep.mubr.msk.f32.mxu0 %vm158_vm0, %v130_v18  ;;  %v324_v28 = vld [vmem:[%s530_s0] ss:$0 sm:$0xff]  ;;  %v133_v59 = vld [vmem:[%s534_s4 + $0x18] sm:$0xff]  ;;  %s399_s4 = smov [#allocation3]  }
  0x11   :  { %v325_v30 = vld [vmem:[%s531_s1] ss:$0 sm:$0xff]  ;;  %s316_s20 = sshll.u32 %s399_s4, 4  ;;  %s317_s20 = int_to_ptr.vmem [resolvable:$true] %s316_s20 }
  0x12   :  { %54 = vperm.xlu0 %370, %v36_v1   ;;  %371 = vset.pattern.permute.xlu1 %v397_v3  ;;  %s373_s21 = scalar_lea.vmem %s317_s20, 16  ;;  %s377_s22 = scalar_lea.vmem %s317_s20, 32 }
  0x13   :  { %85 = vperm.xlu1 %371, %v37_v6   ;;  %p374_p0 = scmp.ne.s32.totalorder %s317_s20, %s373_s21  ;;  %p378_p1 = scmp.lt.s32.totalorder %s317_s20, %s317_s20 }
  0x14   :  { %p379_p2 = scmp.lt.s32.totalorder %s377_s22, %s373_s21 }
  0x16   :  { %109 = vperm.xlu0 %370, %v39_v7   ;;  %p380_p3 = por %p379_p2, %p378_p1 }
  0x17   :  { %372 = vset.pattern.permute.xlu1 %v398_v5 }
  0x18   :  { %104 = vperm.xlu1 %372, %v38_v8   ;;  %p381_p4 = pnand %p380_p3, %p374_p0 }
  0x1a   :  { %140 = vperm.xlu0 %370, %v134_v9  }
  0x1c   :  { %114 = vperm.xlu1 %372, %v40_v10  }
  0x1e   :  { %150 = vperm.xlu0 %370, %v136_v11  }
  0x20   :  { %119 = vperm.xlu1 %372, %v41_v12  }
  0x22   :  { %267 = vperm.xlu0 %370, %v260_v13  }
  0x24   :  { %145 = vperm.xlu1 %372, %v135_v14  }
  0x26   :  { %277 = vperm.xlu0 %370, %v262_v15  }
  0x28   :  { %155 = vperm.xlu1 %372, %v137_v16  }
  0x2a   :  { %300 = vperm.xlu0 %370, %v264_v17  }
  0x2c   :  { %272 = vperm.xlu1 %372, %v261_v20  }
  0x30   :  { %282 = vperm.xlu1 %372, %v263_v21  }
  0x84   :  { %v74_v22 = vpop.permute.xlu1 %73  ;;  %v82_v23 = vpop.permute.xlu0 %81 }
  0x85   :  { %v94_v35 = vmul.f32 %v325_v30, %v74_v22  ;;  %v96_v43 = vmul.f32 %v325_v30, %v82_v23  ;;  %v303_v22 = vlaneseq }
  0x88   :  { %v78_v24 = vpop.permute.xlu1 %77 }
  0x89   :  { %v45_v25 = vpop.permute.xlu0 %44  ;;  %v95_v32 = vmul.f32 %v325_v30, %v78_v24 }
  0x8a   :  { %v68_v33 = vmul.f32 %v324_v28, %v45_v25  ;;  %v304_v25 = vshrl.u32 %v303_v22, 7 }
  0x8c   :  { %v98_v39 = vadd.f32 %v94_v35, %v68_v33 }
  0x8d   :  { %v50_v26 = vpop.permute.xlu0 %49  ;;  %v60_v27 = vpop.permute.xlu1 %59 }
  0x8e   :  { %v69_v29 = vmul.f32 %v324_v28, %v50_v26  ;;  %v71_v48 = vmul.f32 %v324_v28, %v60_v27 }
  0x90   :  { %v99_v36 = vadd.f32 %v95_v32, %v69_v29 }
  0x91   :  { %v55_v31 = vpop.permute.xlu0 %54 }
  0x92   :  { %v86_v34 = vpop.permute.xlu1 %85  ;;  %v70_v41 = vmul.f32 %v324_v28, %v55_v31  ;;  %v305_v28 = vsub.s32 0, %v304_v25 }
  0x93   :  { %v97_v44 = vmul.f32 %v325_v30, %v86_v34 }
  0x94   :  { %v100_v50 = vadd.f32 %v96_v43, %v70_v41 }
  0x95   :  { %v110_v37 = vpop.permute.xlu0 %109  ;;  %v101_v52 = vadd.f32 %v97_v44, %v71_v48 }
  0x96   :  { %v123_v38 = vadd.f32 %v110_v37, %v99_v36 }
  0x97   :  { %v105_v40 = vpop.permute.xlu1 %104 }
  0x98   :  { %v122_v42 = vadd.f32 %v105_v40, %v98_v39  ;;  %v127_v45 = vmax.f32 %v123_v38, 0.0 }
  0x99   :  { %v141_v60 = vpop.permute.xlu0 %140 }
  0x9a   :  { %v126_v46 = vmax.f32 %v122_v42, 0.0 }
  0x9b   :  { %v115_v47 = vpop.permute.xlu1 %114 }
  0x9c   :  { %v352_v49 = vpack.c.bf16 %v127_v45, %v126_v46  ;;  %v124_v51 = vadd.f32 %v115_v47, %v100_v50 }
  0x9d   :  { %v151_v62 = vpop.permute.xlu0 %150 }
  0x9e   :  { %353 = vmatprep.subr.bf16.mxu0 %v352_v49  ;;  %360 = vmatprep.subr.bf16.mxu1 %v352_v49  ;;  %v128_v55 = vmax.f32 %v124_v51, 0.0 }
  0x9f   :  { %v120_v53 = vpop.permute.xlu1 %119  ;;  %355 = vmatpush3.bf16.msra.mxu0 %v352_v49  ;;  %362 = vmatpush3.bf16.msra.mxu1 %v352_v49 }
  0xa0   :  { %v125_v54 = vadd.f32 %v120_v53, %v101_v52 }
  0xa1   :  { %v268_v0 = vpop.permute.xlu0 %267 }
  0xa2   :  { %v129_v56 = vmax.f32 %v125_v54, 0.0 }
  0xa3   :  { %v146_v61 = vpop.permute.xlu1 %145 }
  0xa4   :  { %v356_v57 = vpack.c.bf16 %v129_v56, %v128_v55 }
  0xa5   :  { %v278_v16 = vpop.permute.xlu0 %277 }
  0xa6   :  { %357 = vmatprep.subr.bf16.mxu0 %v356_v57  ;;  %361 = vmatprep.subr.bf16.mxu1 %v356_v57 }
  0xa7   :  { %359 = vmatpush3.bf16.msra.mxu0 %v356_v57  ;;  %363 = vmatpush3.bf16.msra.mxu1 %v356_v57  ;;  %v156_v63 = vpop.permute.xlu1 %155 }
  0xa9   :  { %v301_v30 = vpop.permute.xlu0 %300 }
  0xaa   :  { %347 = vmatmul.mubr.msk.f32.vlgmr.msra.gmra.mrb[0].mxu0 %vm158_vm0, %v131_v58  ;;  %350 = vmatmul.mubr.msk.f32.vlgmr.msra.gmra.mrb[0].mxu1 %vm158_vm0, %v133_v59  ;;  %v306_v32 = vrot.slane %v301_v30, %v305_v28 }
  0xab   :  { %v273_v9 = vpop.permute.xlu1 %272 }
  0xaf   :  { %v283_v19 = vpop.permute.xlu1 %282 }
 0x17d   :  { %v348_v1 = vpop.f32.mrb[0].mxu0  ;;  %v351_v2 = vpop.f32.mrb[0].mxu1 }
 0x17e   :  { %v243_v3 = vadd.f32 %v348_v1, %v146_v61  ;;  %v237_v4 = vpop.f32.mrb[1].mxu0  ;;  %v247_v5 = vpop.f32.mrb[1].mxu1  ;;  %v253_v6 = vadd.f32 %v351_v2, %v156_v63 }
 0x17f   :  { %v238_v7 = vadd.f32 %v237_v4, %v141_v60  ;;  %v248_v8 = vadd.f32 %v247_v5, %v151_v62 }
 0x180   :  { %v257_v10 = vmax.f32 %v243_v3, 0.0  ;;  %v259_v14 = vmax.f32 %v253_v6, 0.0 }
 0x181   :  { %v256_v11 = vmax.f32 %v238_v7, 0.0  ;;  %v258_v12 = vmax.f32 %v248_v8, 0.0 }
 0x182   :  { %v286_v13 = vmul.f32 %v273_v9, %v257_v10  ;;  %v288_v20 = vmul.f32 %v283_v19, %v259_v14 }
 0x183   :  { %v285_v15 = vmul.f32 %v268_v0, %v256_v11  ;;  %v287_v18 = vmul.f32 %v278_v16, %v258_v12 }
 0x185   :  { %v289_v17 = vadd.f32 %v286_v13, %v285_v15 }
 0x187   :  { %v290_v21 = vadd.f32 %v289_v17, %v287_v18 }
 0x189   :  { %v291_v23 = vadd.f32 %v290_v21, %v288_v20 }
 0x18b   :  { %v292_v24 = vrot.slane %v291_v23, 4 }
 0x18d   :  { %v293_v26 = vadd.f32 %v292_v24, %v291_v23 }
 0x18f   :  { %v294_v27 = vrot.slane %v293_v26, 2 }
 0x191   :  { %v295_v29 = vadd.f32 %v294_v27, %v293_v26 }
 0x193   :  { %v296_v31 = vrot.slane %v295_v29, 1 }
 0x195   :  { %v297_v33 = vadd.f32 %v296_v31, %v295_v29 }
 0x197   :  { %v307_v34 = vadd.f32 %v306_v32, %v297_v33 }
 0x199   :  { %v308_v35 = vmax.f32 %v307_v34, 0.0 }
 0x19b   :  { %309 = vst [vmem:[#allocation3] sm:$0x1] %v308_v35 }
 0x19c   :  { %384 = shalt.err (!%p381_p4)
}
 0x19d   :  { %s385_s25 = scalar_lea.hbm %s538_s8, 16 }
 0x19e   :  { %p386_p5 = scmp.ne.s32.totalorder %s538_s8, %s385_s25  ;;  %p389_p6 = scmp.lt.u32.totalorder %s385_s25, %s538_s8 }
 0x1a0   :  { %p391_p7 = pnand %p389_p6, %p386_p5 }
 0x1a2   :  { %394 = shalt.err (!%p391_p7)
}
 0x1a3   :  { %319 = dma.vmem_to_hbm [thread:$0]  %s317_s20, 16, %s538_s8, [#allocation4]  }
 0x1a4   :  { %395 = dma.done.wait [#allocation4], 16  }
 0x1a5   :  { %396 = vsyncadd [#allocation4], 4294967280 }
 0x1a6   :  { %323 = vsyncpa [#allocation4], 1 }

</bundles_post_ra>
